<compile_context>
chip_gen: v7x
topology: tpu7x:2x2x1
jax: 0.10.0
libtpu: 0.0.40
codegen_flags: <defaults>
</compile_context>

<pallas_src>
import functools

import jax
import jax.numpy as jnp
from jax import lax
from jax.experimental import pallas as pl
from jax.experimental.pallas import tpu as pltpu


def _cross_attention_kernel(q_ref, kv_ref, wq_ref, wp_ref, bp_ref, o_ref,
                            qp_sc, m_sc, l_sc, acc_sc, *,
                            scale, bt, nq, d, compute_dtype, approx_recip):
    k_idx = pl.program_id(1)
    n_kv = pl.num_programs(1)

    @pl.when(k_idx == 0)
    def _init():
        # q projection once per batch block; fold batch into M for MXU fill.
        q2d = q_ref[...].reshape(bt * nq, d).astype(compute_dtype)
        qp = jnp.dot(q2d, wq_ref[...], preferred_element_type=jnp.float32)
        # Fold the softmax scale into q (cheaper than scaling (nq, nk) scores).
        qp_sc[...] = (qp * scale).reshape(bt, nq, d).astype(qp_sc.dtype)
        m_sc[...] = jnp.full_like(m_sc, -jnp.inf)
        l_sc[...] = jnp.zeros_like(l_sc)
        acc_sc[...] = jnp.zeros_like(acc_sc)

    # kv tile loaded/cast once, reused for both the K and V matmuls.
    kv = kv_ref[...].astype(compute_dtype)                      # (bt, tk, d)

    # Scores: contract last dims directly (no explicit kv transpose).
    s = lax.dot_general(qp_sc[...], kv,
                        dimension_numbers=(((2,), (2,)), ((0,), (0,))),
                        preferred_element_type=jnp.float32)     # (bt, nq, tk)

    # Online (flash-style) softmax update.
    m_prev = m_sc[...]
    m_new = jnp.maximum(m_prev, jnp.max(s, axis=-1, keepdims=True))
    alpha = jnp.exp(m_prev - m_new)
    p = jnp.exp(s - m_new)
    l_sc[...] = alpha * l_sc[...] + jnp.sum(p, axis=-1, keepdims=True)
    acc_sc[...] = alpha * acc_sc[...] + lax.dot_general(
        p.astype(compute_dtype), kv,
        dimension_numbers=(((2,), (1,)), ((0,), (0,))),
        preferred_element_type=jnp.float32)                     # (bt, nq, d)
    m_sc[...] = m_new

    @pl.when(k_idx == n_kv - 1)
    def _finalize():
        inv_l = pl.reciprocal(l_sc[...], approx=approx_recip)
        ctx = (acc_sc[...] * inv_l).reshape(bt * nq, d).astype(compute_dtype)
        out = jnp.dot(ctx, wp_ref[...],
                      preferred_element_type=jnp.float32) + bp_ref[...]
        o_ref[...] = out.reshape(bt, nq, d).astype(o_ref.dtype)


def _vmem_bytes(bt, tk, nq, d, in_bytes, out_bytes, comp_bytes):
    """Rough per-step VMEM model (double-buffered streams, single-buffered weights)."""
    q_slab = bt * nq * d * in_bytes * 2
    kv_slab = bt * tk * d * in_bytes * 2
    o_slab = bt * nq * d * out_bytes * 2
    weights = 2 * d * d * comp_bytes + d * 4            # Buffered(1) -> 1x
    scratch = bt * nq * d * (comp_bytes + 4) + 2 * bt * nq * 4
    live = 3 * bt * nq * tk * 4 + bt * nq * d * 4        # s / p / temporaries
    return q_slab + kv_slab + o_slab + weights + scratch + live


def _choose_blocks(B, Nq, Nk, D, in_bytes, out_bytes, comp_bytes, budget):
    # kv tile: largest divisor of Nk that is a multiple of 8 and <= 512
    # (sublane-aligned so the (bt, tk, D) BlockSpec is layout-legal); else Nk.
    tk_cands = [t for t in range(8, min(Nk, 512) + 1, 8) if Nk % t == 0]
    tk = max(tk_cands) if tk_cands else Nk

    # batch block: largest divisor of B that fits the VMEM budget; keep >= 2
    # grid steps over the batch axis when B >= 2 (v7x has 2 TensorCores).
    bt_cands = [b for b in range(1, B + 1) if B % b == 0]
    if B >= 2:
        bt_cands = [b for b in bt_cands if B // b >= 2]
    best = None
    for b in sorted(bt_cands):
        if _vmem_bytes(b, tk, Nq, D, in_bytes, out_bytes, comp_bytes) <= budget:
            best = b
    if best is None:
        best = min(bt_cands)   # smallest legal block; may still spill at huge D
    return best, tk


def cross_attention(query, kv, wq, wp, bp, *, num_heads=8, qk_scale=None,
                    batch_block=None, kv_block=None, compute_dtype=None,
                    approx_recip=True, vmem_budget_bytes=None):
    """query: (B, Nq, D), kv: (B, Nk, D); wq/wp: (D, D) used as x @ W; bp: (1, D)."""
    B, Nq, D = query.shape
    Bk, Nk, Dk = kv.shape
    assert (B, D) == (Bk, Dk)
    head_dim = D // num_heads
    scale = qk_scale if qk_scale is not None else head_dim ** (-0.5)

    # MXU compute dtype: bf16 when the problem is big enough (or already bf16),
    # f32 otherwise (keeps the small-D test numerically tight). Accumulation is
    # always f32 via preferred_element_type.
    if compute_dtype is None:
        compute_dtype = (jnp.bfloat16
                         if (query.dtype == jnp.bfloat16 or D >= 512)
                         else jnp.float32)
    comp_bytes = jnp.dtype(compute_dtype).itemsize
    in_bytes = jnp.dtype(query.dtype).itemsize
    out_bytes = in_bytes

    # VMEM budget: ~75% of the device's capacity (v7x: ~48 MiB of 64; v5e/v6e:
    # ~96 MiB of 128). Fallback assumes the smallest (v7x-safe) capacity.
    if vmem_budget_bytes is None:
        try:
            cap = getattr(pltpu.get_tpu_info(), "vmem_capacity_bytes",
                          64 * 1024 * 1024)
        except Exception:
            cap = 64 * 1024 * 1024
        vmem_budget_bytes = int(cap * 0.75)

    bt, tk = _choose_blocks(B, Nq, Nk, D, in_bytes, out_bytes, comp_bytes,
                            vmem_budget_bytes)
    if batch_block is not None:
        bt = batch_block
    if kv_block is not None:
        tk = kv_block
    assert B % bt == 0 and Nk % tk == 0
    grid = (B // bt, Nk // tk)

    # Pre-cast resident weights to the compute dtype (halves their VMEM/DMA
    # footprint when bf16); bias stays f32 (added to the f32 accumulator).
    wq_c = wq.astype(compute_dtype)
    wp_c = wp.astype(compute_dtype)
    bp_f32 = bp.astype(jnp.float32)

    kernel = functools.partial(
        _cross_attention_kernel, scale=scale, bt=bt, nq=Nq, d=D,
        compute_dtype=compute_dtype, approx_recip=approx_recip)

    out = pl.pallas_call(
        kernel,
        out_shape=jax.ShapeDtypeStruct((B, Nq, D), query.dtype),
        grid_spec=pltpu.PrefetchScalarGridSpec(
            num_scalar_prefetch=0,
            grid=grid,
            in_specs=[
                # query block: resident across the kv axis (index constant in k).
                pl.BlockSpec((bt, Nq, D), lambda b, k: (b, 0, 0)),
                # kv tile: streamed along the kv axis.
                pl.BlockSpec((bt, tk, D), lambda b, k: (b, k, 0)),
                # Weights / bias: constant index_map + single-buffered.
                pl.BlockSpec((D, D), lambda b, k: (0, 0),
                             pipeline_mode=pl.Buffered(1)),
                pl.BlockSpec((D, D), lambda b, k: (0, 0),
                             pipeline_mode=pl.Buffered(1)),
                pl.BlockSpec((1, D), lambda b, k: (0, 0),
                             pipeline_mode=pl.Buffered(1)),
            ],
            out_specs=pl.BlockSpec((bt, Nq, D), lambda b, k: (b, 0, 0)),
            scratch_shapes=[
                pltpu.VMEM((bt, Nq, D), compute_dtype),   # cached scaled q-proj
                pltpu.VMEM((bt, Nq, 1), jnp.float32),     # running max m
                pltpu.VMEM((bt, Nq, 1), jnp.float32),     # running denom l
                pltpu.VMEM((bt, Nq, D), jnp.float32),     # unnormalized acc
            ],
        ),
        compiler_params=pltpu.CompilerParams(
            dimension_semantics=("parallel", "arbitrary"),
            vmem_limit_bytes=int(vmem_budget_bytes),
        ),
    )(query, kv, wq_c, wp_c, bp_f32)

    return out


def cross_attention_ref(query, kv, wq, wp, bp, *, num_heads=8, qk_scale=None):
    D = query.shape[-1]
    scale = qk_scale if qk_scale is not None else (D // num_heads) ** (-0.5)
    q = query @ wq
    attn = jax.nn.softmax(jnp.einsum("bqd,bkd->bqk", q, kv) * scale, axis=-1)
    out = jnp.einsum("bqk,bkd->bqd", attn, kv)
    return out @ wp + bp


if __name__ == "__main__":
    # Small shapes consistent with the module: dim=32, num_heads=8 -> head_dim=4.
    B, Nq, Nk, D = 2, 8, 8, 32
    num_heads = 8

    key = jax.random.PRNGKey(0)
    k_q, k_kv, k_wq, k_wp, k_bp = jax.random.split(key, 5)

    query = jax.random.normal(k_q, (B, Nq, D), dtype=jnp.float32)
    kv = jax.random.normal(k_kv, (B, Nk, D), dtype=jnp.float32)

    # Deterministic synthetic parameters (torch Linear weights stored already
    # transposed so the kernel computes x @ W).
    wq = jax.random.normal(k_wq, (D, D), dtype=jnp.float32) * 0.05   # q proj, no bias
    wp = jax.random.normal(k_wp, (D, D), dtype=jnp.float32) * 0.05   # out proj weight
    bp = jax.random.normal(k_bp, (1, D), dtype=jnp.float32) * 0.05   # out proj bias

    out = cross_attention(query, kv, wq, wp, bp, num_heads=num_heads)
    out = jax.block_until_ready(out)

    ref = cross_attention_ref(query, kv, wq, wp, bp, num_heads=num_heads)
    assert out.shape == (B, Nq, D)
    # Tolerance allows the EUP approximate reciprocal in the softmax denominator
    # (sub-1e-3 relative effect); pass approx_recip=False for exact parity.
    assert jnp.allclose(out, ref, atol=2e-3, rtol=2e-3), "mismatch vs reference"

    print("KERNEL_OK")
</pallas_src>

<mosaic_0001>
module attributes {stable_mosaic.version = 11 : i64} {
  func.func @_cross_attention_kernel(%arg0: i32, %arg1: i32, %arg2: memref<1x8x32xf32, #tpu.memory_space<vmem>>, %arg3: memref<1x8x32xf32, #tpu.memory_space<vmem>>, %arg4: memref<32x32xf32, #tpu.memory_space<vmem>>, %arg5: memref<32x32xf32, #tpu.memory_space<vmem>>, %arg6: memref<1x32xf32, #tpu.memory_space<vmem>>, %arg7: memref<1x8x32xf32, #tpu.memory_space<vmem>>, %arg8: memref<1x8x32xf32, #tpu.memory_space<vmem>>, %arg9: memref<1x8x1xf32, #tpu.memory_space<vmem>>, %arg10: memref<1x8x1xf32, #tpu.memory_space<vmem>>, %arg11: memref<1x8x32xf32, #tpu.memory_space<vmem>>) attributes {dimension_semantics = [#tpu.dimension_semantics<parallel>, #tpu.dimension_semantics<arbitrary>], iteration_bounds = array<i64: 2, 1>, scalar_prefetch = 0 : i64, scratch_operands = 4 : i64, tpu.core_type = #tpu.core_type<tc>, window_params = [{transform_indices = @transform_0, window_bounds = array<i64: 1, 8, 32>}, {transform_indices = @transform_1, window_bounds = array<i64: 1, 8, 32>}, {pipeline_mode = #tpu.pipeline_mode<synchronous>, transform_indices = @transform_2, window_bounds = array<i64: 32, 32>}, {pipeline_mode = #tpu.pipeline_mode<synchronous>, transform_indices = @transform_3, window_bounds = array<i64: 32, 32>}, {pipeline_mode = #tpu.pipeline_mode<synchronous>, transform_indices = @transform_4, window_bounds = array<i64: 1, 32>}, {transform_indices = @transform_5, window_bounds = array<i64: 1, 8, 32>}]} {
    %c0_i32 = arith.constant 0 : i32
    %0 = arith.cmpi eq, %arg1, %c0_i32 : i32
    %1 = arith.extui %0 : i1 to i32
    %c0_i32_0 = arith.constant 0 : i32
    %2 = arith.cmpi ne, %1, %c0_i32_0 : i32
    scf.if %2 {
      %c0_29 = arith.constant 0 : index
      %c0_30 = arith.constant 0 : index
      %c0_31 = arith.constant 0 : index
      %31 = vector.load %arg2[%c0_29, %c0_30, %c0_31] : memref<1x8x32xf32, #tpu.memory_space<vmem>>, vector<1x8x32xf32>
      %32 = vector.shape_cast %31 : vector<1x8x32xf32> to vector<8x32xf32>
      %c0_32 = arith.constant 0 : index
      %c0_33 = arith.constant 0 : index
      %33 = vector.load %arg4[%c0_32, %c0_33] : memref<32x32xf32, #tpu.memory_space<vmem>>, vector<32x32xf32>
      %cst_34 = arith.constant dense<0.000000e+00> : vector<8x32xf32>
      %34 = tpu.matmul %32, %33, %cst_34 {dimension_numbers = #tpu.dot_dimension_numbers<[1], [0], [0], [1], [0, 0, 1, 1], [], []>} : vector<8x32xf32>, vector<32x32xf32>, vector<8x32xf32> -> vector<8x32xf32>
      %cst_35 = arith.constant 5.000000e-01 : f32
      %35 = vector.broadcast %cst_35 : f32 to vector<8x32xf32>
      %36 = arith.mulf %34, %35 : vector<8x32xf32>
      %37 = vector.shape_cast %36 : vector<8x32xf32> to vector<1x8x32xf32>
      %c0_36 = arith.constant 0 : index
      %c0_37 = arith.constant 0 : index
      %c0_38 = arith.constant 0 : index
      %38 = vector.load %arg8[%c0_36, %c0_37, %c0_38] : memref<1x8x32xf32, #tpu.memory_space<vmem>>, vector<1x8x32xf32>
      tpu.vector_store %arg8[%c0_36, %c0_37, %c0_38], %37 {strides = array<i32>} : memref<1x8x32xf32, #tpu.memory_space<vmem>>, vector<1x8x32xf32>,
      %cst_39 = arith.constant 0xFF800000 : f32
      %39 = vector.broadcast %cst_39 : f32 to vector<1x8x1xf32>
      %c0_40 = arith.constant 0 : index
      %c0_41 = arith.constant 0 : index
      %c0_42 = arith.constant 0 : index
      %40 = vector.load %arg9[%c0_40, %c0_41, %c0_42] : memref<1x8x1xf32, #tpu.memory_space<vmem>>, vector<1x8x1xf32>
      tpu.vector_store %arg9[%c0_40, %c0_41, %c0_42], %39 {strides = array<i32>} : memref<1x8x1xf32, #tpu.memory_space<vmem>>, vector<1x8x1xf32>,
      %cst_43 = arith.constant 0.000000e+00 : f32
      %41 = vector.broadcast %cst_43 : f32 to vector<1x8x1xf32>
      %c0_44 = arith.constant 0 : index
      %c0_45 = arith.constant 0 : index
      %c0_46 = arith.constant 0 : index
      %42 = vector.load %arg10[%c0_44, %c0_45, %c0_46] : memref<1x8x1xf32, #tpu.memory_space<vmem>>, vector<1x8x1xf32>
      tpu.vector_store %arg10[%c0_44, %c0_45, %c0_46], %41 {strides = array<i32>} : memref<1x8x1xf32, #tpu.memory_space<vmem>>, vector<1x8x1xf32>,
      %cst_47 = arith.constant 0.000000e+00 : f32
      %43 = vector.broadcast %cst_47 : f32 to vector<1x8x32xf32>
      %c0_48 = arith.constant 0 : index
      %c0_49 = arith.constant 0 : index
      %c0_50 = arith.constant 0 : index
      %44 = vector.load %arg11[%c0_48, %c0_49, %c0_50] : memref<1x8x32xf32, #tpu.memory_space<vmem>>, vector<1x8x32xf32>
      tpu.vector_store %arg11[%c0_48, %c0_49, %c0_50], %43 {strides = array<i32>} : memref<1x8x32xf32, #tpu.memory_space<vmem>>, vector<1x8x32xf32>,
    } else {
    }
    %c0 = arith.constant 0 : index
    %c0_1 = arith.constant 0 : index
    %c0_2 = arith.constant 0 : index
    %3 = vector.load %arg3[%c0, %c0_1, %c0_2] : memref<1x8x32xf32, #tpu.memory_space<vmem>>, vector<1x8x32xf32>
    %c0_3 = arith.constant 0 : index
    %c0_4 = arith.constant 0 : index
    %c0_5 = arith.constant 0 : index
    %4 = vector.load %arg8[%c0_3, %c0_4, %c0_5] : memref<1x8x32xf32, #tpu.memory_space<vmem>>, vector<1x8x32xf32>
    %cst = arith.constant dense<0.000000e+00> : vector<1x8x8xf32>
    %5 = tpu.matmul %4, %3, %cst {dimension_numbers = #tpu.dot_dimension_numbers<[2], [2], [1], [1], [0, 0, 0, 1, 1, 1], [0], [0]>} : vector<1x8x32xf32>, vector<1x8x32xf32>, vector<1x8x8xf32> -> vector<1x8x8xf32>
    %c0_6 = arith.constant 0 : index
    %c0_7 = arith.constant 0 : index
    %c0_8 = arith.constant 0 : index
    %6 = vector.load %arg9[%c0_6, %c0_7, %c0_8] : memref<1x8x1xf32, #tpu.memory_space<vmem>>, vector<1x8x1xf32>
    %cst_9 = arith.constant dense<0xFF800000> : vector<1x8xf32>
    %7 = vector.multi_reduction <maximumf>, %5, %cst_9 [2] : vector<1x8x8xf32> to vector<1x8xf32>
    %8 = vector.shape_cast %7 : vector<1x8xf32> to vector<1x8x1xf32>
    %9 = arith.maximumf %6, %8 : vector<1x8x1xf32>
    %10 = arith.subf %6, %9 : vector<1x8x1xf32>
    %11 = math.exp %10 : vector<1x8x1xf32>
    %12 = vector.broadcast %9 : vector<1x8x1xf32> to vector<1x8x8xf32>
    %13 = arith.subf %5, %12 : vector<1x8x8xf32>
    %14 = math.exp %13 : vector<1x8x8xf32>
    %c0_10 = arith.constant 0 : index
    %c0_11 = arith.constant 0 : index
    %c0_12 = arith.constant 0 : index
    %15 = vector.load %arg10[%c0_10, %c0_11, %c0_12] : memref<1x8x1xf32, #tpu.memory_space<vmem>>, vector<1x8x1xf32>
    %16 = arith.mulf %11, %15 : vector<1x8x1xf32>
    %cst_13 = arith.constant dense<0.000000e+00> : vector<1x8xf32>
    %17 = vector.multi_reduction <add>, %14, %cst_13 [2] : vector<1x8x8xf32> to vector<1x8xf32>
    %18 = vector.shape_cast %17 : vector<1x8xf32> to vector<1x8x1xf32>
    %19 = arith.addf %16, %18 : vector<1x8x1xf32>
    %c0_14 = arith.constant 0 : index
    %c0_15 = arith.constant 0 : index
    %c0_16 = arith.constant 0 : index
    %20 = vector.load %arg10[%c0_14, %c0_15, %c0_16] : memref<1x8x1xf32, #tpu.memory_space<vmem>>, vector<1x8x1xf32>
    tpu.vector_store %arg10[%c0_14, %c0_15, %c0_16], %19 {strides = array<i32>} : memref<1x8x1xf32, #tpu.memory_space<vmem>>, vector<1x8x1xf32>,
    %c0_17 = arith.constant 0 : index
    %c0_18 = arith.constant 0 : index
    %c0_19 = arith.constant 0 : index
    %21 = vector.load %arg11[%c0_17, %c0_18, %c0_19] : memref<1x8x32xf32, #tpu.memory_space<vmem>>, vector<1x8x32xf32>
    %22 = vector.broadcast %11 : vector<1x8x1xf32> to vector<1x8x32xf32>
    %23 = arith.mulf %22, %21 : vector<1x8x32xf32>
    %cst_20 = arith.constant dense<0.000000e+00> : vector<1x8x32xf32>
    %24 = tpu.matmul %14, %3, %cst_20 {dimension_numbers = #tpu.dot_dimension_numbers<[2], [1], [1], [2], [0, 0, 0, 1, 1, 2], [0], [0]>} : vector<1x8x8xf32>, vector<1x8x32xf32>, vector<1x8x32xf32> -> vector<1x8x32xf32>
    %25 = arith.addf %23, %24 : vector<1x8x32xf32>
    %c0_21 = arith.constant 0 : index
    %c0_22 = arith.constant 0 : index
    %c0_23 = arith.constant 0 : index
    %26 = vector.load %arg11[%c0_21, %c0_22, %c0_23] : memref<1x8x32xf32, #tpu.memory_space<vmem>>, vector<1x8x32xf32>
    tpu.vector_store %arg11[%c0_21, %c0_22, %c0_23], %25 {strides = array<i32>} : memref<1x8x32xf32, #tpu.memory_space<vmem>>, vector<1x8x32xf32>,
    %c0_24 = arith.constant 0 : index
    %c0_25 = arith.constant 0 : index
    %c0_26 = arith.constant 0 : index
    %27 = vector.load %arg9[%c0_24, %c0_25, %c0_26] : memref<1x8x1xf32, #tpu.memory_space<vmem>>, vector<1x8x1xf32>
    tpu.vector_store %arg9[%c0_24, %c0_25, %c0_26], %9 {strides = array<i32>} : memref<1x8x1xf32, #tpu.memory_space<vmem>>, vector<1x8x1xf32>,
    %c0_i32_27 = arith.constant 0 : i32
    %28 = arith.cmpi eq, %arg1, %c0_i32_27 : i32
    %29 = arith.extui %28 : i1 to i32
    %c0_i32_28 = arith.constant 0 : i32
    %30 = arith.cmpi ne, %29, %c0_i32_28 : i32
    scf.if %30 {
      %c0_29 = arith.constant 0 : index
      %c0_30 = arith.constant 0 : index
      %c0_31 = arith.constant 0 : index
      %31 = vector.load %arg10[%c0_29, %c0_30, %c0_31] : memref<1x8x1xf32, #tpu.memory_space<vmem>>, vector<1x8x1xf32>
      %32 = tpu.reciprocal %31 {approx = true} : vector<1x8x1xf32> -> vector<1x8x1xf32>
      %c0_32 = arith.constant 0 : index
      %c0_33 = arith.constant 0 : index
      %c0_34 = arith.constant 0 : index
      %33 = vector.load %arg11[%c0_32, %c0_33, %c0_34] : memref<1x8x32xf32, #tpu.memory_space<vmem>>, vector<1x8x32xf32>
      %34 = vector.broadcast %32 : vector<1x8x1xf32> to vector<1x8x32xf32>
      %35 = arith.mulf %33, %34 : vector<1x8x32xf32>
      %36 = vector.shape_cast %35 : vector<1x8x32xf32> to vector<8x32xf32>
      %c0_35 = arith.constant 0 : index
      %c0_36 = arith.constant 0 : index
      %37 = vector.load %arg5[%c0_35, %c0_36] : memref<32x32xf32, #tpu.memory_space<vmem>>, vector<32x32xf32>
      %cst_37 = arith.constant dense<0.000000e+00> : vector<8x32xf32>
      %38 = tpu.matmul %36, %37, %cst_37 {dimension_numbers = #tpu.dot_dimension_numbers<[1], [0], [0], [1], [0, 0, 1, 1], [], []>} : vector<8x32xf32>, vector<32x32xf32>, vector<8x32xf32> -> vector<8x32xf32>
      %c0_38 = arith.constant 0 : index
      %c0_39 = arith.constant 0 : index
      %39 = vector.load %arg6[%c0_38, %c0_39] : memref<1x32xf32, #tpu.memory_space<vmem>>, vector<1x32xf32>
      %40 = vector.broadcast %39 : vector<1x32xf32> to vector<8x32xf32>
      %41 = arith.addf %38, %40 : vector<8x32xf32>
      %42 = vector.shape_cast %41 : vector<8x32xf32> to vector<1x8x32xf32>
      %c0_40 = arith.constant 0 : index
      %c0_41 = arith.constant 0 : index
      %c0_42 = arith.constant 0 : index
      %43 = vector.load %arg7[%c0_40, %c0_41, %c0_42] : memref<1x8x32xf32, #tpu.memory_space<vmem>>, vector<1x8x32xf32>
      tpu.vector_store %arg7[%c0_40, %c0_41, %c0_42], %42 {strides = array<i32>} : memref<1x8x32xf32, #tpu.memory_space<vmem>>, vector<1x8x32xf32>,
    } else {
    }
    return
  }
  func.func @transform_0(%arg0: i32, %arg1: i32) -> (i32, i32, i32) {
    %c0_i32 = arith.constant 0 : i32
    %c0_i32_0 = arith.constant 0 : i32
    %c0_i32_1 = arith.constant 0 : i32
    return %arg0, %c0_i32, %c0_i32_0 : i32, i32, i32
  }
  func.func @transform_1(%arg0: i32, %arg1: i32) -> (i32, i32, i32) {
    %c0_i32 = arith.constant 0 : i32
    %c0_i32_0 = arith.constant 0 : i32
    return %arg0, %arg1, %c0_i32 : i32, i32, i32
  }
  func.func @transform_2(%arg0: i32, %arg1: i32) -> (i32, i32) {
    %c0_i32 = arith.constant 0 : i32
    %c0_i32_0 = arith.constant 0 : i32
    %c0_i32_1 = arith.constant 0 : i32
    return %c0_i32, %c0_i32_0 : i32, i32
  }
  func.func @transform_3(%arg0: i32, %arg1: i32) -> (i32, i32) {
    %c0_i32 = arith.constant 0 : i32
    %c0_i32_0 = arith.constant 0 : i32
    %c0_i32_1 = arith.constant 0 : i32
    return %c0_i32, %c0_i32_0 : i32, i32
  }
  func.func @transform_4(%arg0: i32, %arg1: i32) -> (i32, i32) {
    %c0_i32 = arith.constant 0 : i32
    %c0_i32_0 = arith.constant 0 : i32
    %c0_i32_1 = arith.constant 0 : i32
    return %c0_i32, %c0_i32_0 : i32, i32
  }
  func.func @transform_5(%arg0: i32, %arg1: i32) -> (i32, i32, i32) {
    %c0_i32 = arith.constant 0 : i32
    %c0_i32_0 = arith.constant 0 : i32
    %c0_i32_1 = arith.constant 0 : i32
    return %arg0, %c0_i32, %c0_i32_0 : i32, i32, i32
  }
}

</mosaic_0001>

<bundles_post_ra>
// kernel: tpu_custom_call.1
= control target key start
LH: loop header
LB: loop body
LE: loop exit
PB: predicated region body
PF: predicated region fallthrough
CT: control target
= control target key end

     0   :  { %s1585_s0 = inlined_call_operand.hbm [shape: f32[2,8,32], index: 0, kind: input, shape index: {}]   ;;  %s1586_s1 = inlined_call_operand.hbm [shape: f32[2,8,32], index: 1, kind: input, shape index: {}]   ;;  %s1587_s2 = inlined_call_operand.hbm [shape: f32[32,32], index: 2, kind: input, shape index: {}]   ;;  %s1588_s3 = inlined_call_operand.hbm [shape: f32[32,32], index: 3, kind: input, shape index: {}]   ;;  %s1589_s4 = inlined_call_operand.vmem [shape: f32[1,32], index: 4, kind: input, shape index: {}]   ;;  %s1590_s5 = inlined_call_operand.hbm [shape: f32[2,8,32], index: 5, kind: output, shape index: {}]  }
   0x1   :  { %1597 = sst [smem:[#allocation22_spill]] %s1587_s2 }
   0x2   :  { %1598 = sst [smem:[#allocation23_spill]] %s1588_s3 }
   0x3   :  { %10 = vsyncpa [#allocation7], 0 }
   0x4   :  { %12 = vsyncpa [#allocation7 + $0x1], 0 }
   0x5   :  { %13 = vsyncpa [#allocation10], 0 }
   0x6   :  { %15 = vsyncpa [#allocation10 + $0x1], 0 }
   0x7   :  { %16 = vsyncpa [#allocation13], 0 }
   0x8   :  { %17 = vsyncpa [#allocation8], 0 }
   0x9   :  { %19 = vsyncpa [#allocation8 + $0x1], 0  ;;  %s1270_s18 = smov 0   ;;  %s1272_s19 = smov 0  }
   0xa   :  { %s1274_s20 = smov 0   ;;  %s1276_s21 = smov 0  }
   0xb   :  { %s1278_s22 = smov 0   ;;  %s1280_s23 = smov 0  }
   0xc LB: > { %1599 = sst [smem:[#allocation20_spill]] %s1222_s22  ;;  %s1301_s24 = sadd.s32 4294967295, %s1226_s23   ;;  %s1226_s23 = sphi %s1280_s23, %s25_s23   ;;  %s1222_s22 = sphi %s1278_s22, %s1620_s22   ;;  %s1218_s21 = sphi %s1276_s21, %s1619_s21   ;;  %s1214_s20 = sphi %s1274_s20, %s1623_s20   ;;  %s1210_s19 = sphi %s1272_s19, %s1622_s19   ;;  %s1206_s18 = sphi %s1270_s18, %s1621_s18  }
   0xd   : > { %s830_s25 = sadd.s32 4294967294, %s1226_s23   ;;  %p57_p0 = scmp.ne.s32.totalorder %s1210_s19, %s1206_s18 }
   0xe   : > { %p1591_p1 = scmp.eq.s32.totalorder %s1301_s24, 0  ;;  %p178_p3 = scmp.eq.s32.totalorder %s830_s25, 1 }
   0xf   : > { %p831_p5 = scmp.ge.s32.totalorder %s1226_s23, 1  ;;  %p185_p7 = scmp.lt.s32.totalorder %s1226_s23, 3 }
  0x10   : > { %p1310_p4 = por %p1591_p1, %p57_p0  ;;  %p1315_p6 = por %p178_p3, %p57_p0 }
  0x11   : > { %p1320_p8 = pnand %p831_p5, %p185_p7  ;;  %s1228_s29 = smov [#allocation11]  }
  0x12   : > { %s1600_s26 = scalar_select %p1310_p4, 1, 0 }
  0x13   : > { %s1601_s27 = scalar_select %p1315_p6, 1, 0 }
  0x14   : > { %s1602_s28 = scalar_select %p1320_p8, 1, 0 }
  0x15   : > { %s197_s30 = sshll.u32 %s1228_s29, 4  ;;  %p927_p9 = pneg %p1320_p8  ;;  %s1324_s30 = int_to_ptr.vmem [resolvable:$true] %s197_s30 }
  0x16   : > { %s1229_s7 = smov [#allocation12]   ;;  %s1604_s2 = sld [smem:[#allocation22_spill]] }
  0x17   : > { %p1331_p11 = pnand %p927_p9, %p1591_p1  ;;  %s210_s8 = sshll.u32 %s1229_s7, 4  ;;  %s1335_s8 = int_to_ptr.vmem [resolvable:$true] %s210_s8 }
  0x19   : > { %p1018_p13 = pneg %p1331_p11 }
  0x1c   : > { %s1016_s11 = scalar_lea.hbm %s1604_s2, 512 }
  0x1d   : > { %p1017_p12 = scmp.ne.s32.totalorder %s1604_s2, %s1016_s11  ;;  %p1023_p5 = scmp.lt.u32.totalorder %s1016_s11, %s1604_s2 }
  0x1f   : > { %p1019_p0 = pnand %p1018_p13, %p1017_p12 }
  0x21   : > { %p1020_p3 = pneg %p1019_p0 }
  0x23   : > { %p1025_p7 = pnand %p1023_p5, %p1020_p3 }
  0x25   : > { %1028 = shalt.err (!%p1025_p7)
}
  0x26   : > { %s1029_s16 = scalar_lea.vmem %s1324_s30, 512  ;;  %p1037_p2 = scmp.lt.s32.totalorder %s1324_s30, %s1324_s30 }
  0x27   : > { %p1030_p9 = scmp.ne.s32.totalorder %s1324_s30, %s1029_s16  ;;  %p1038_p12 = scmp.lt.s32.totalorder %s1029_s16, %s1029_s16 }
  0x29   : > { %p1032_p10 = pnand %p1030_p9, %p1018_p13  ;;  %p1039_p0 = por %p1038_p12, %p1037_p2 }
  0x2b   : > { %p1033_p1 = pneg %p1032_p10 }
  0x2d   : > { %p1040_p6 = pnand %p1039_p0, %p1033_p1 }
  0x2f   : > { %1043 = shalt.err (!%p1040_p6)
}
  0x30   : > { %s1230_s17 = smov 128   ;;  %s1231_s25 = smov 8  }
  0x31   : > { %930 = dma.hbm_to_vmem [thread:$0]  (!%p1331_p11), %s1604_s2, 512, %s1324_s30, [#allocation10], %s1230_s17, %s1230_s17, %s1231_s25  }
  0x32   : > { %s1605_s3 = sld [smem:[#allocation23_spill]] }
  0x38   : > { %s1044_s11 = scalar_lea.hbm %s1605_s3, 512 }
  0x39   : > { %p1045_p2 = scmp.ne.s32.totalorder %s1605_s3, %s1044_s11  ;;  %p1051_p10 = scmp.lt.u32.totalorder %s1044_s11, %s1605_s3 }
  0x3b   : > { %p1047_p1 = pnand %p1045_p2, %p1018_p13 }
  0x3d   : > { %p1048_p6 = pneg %p1047_p1 }
  0x3f   : > { %p1053_p3 = pnand %p1051_p10, %p1048_p6 }
  0x41   : > { %1056 = shalt.err (!%p1053_p3)
}
  0x42   : > { %s1057_s30 = scalar_lea.vmem %s1335_s8, 512  ;;  %p1065_p12 = scmp.lt.s32.totalorder %s1335_s8, %s1335_s8 }
  0x43   : > { %p1058_p5 = scmp.ne.s32.totalorder %s1335_s8, %s1057_s30  ;;  %p1066_p0 = scmp.lt.s32.totalorder %s1057_s30, %s1057_s30 }
  0x45   : > { %p1060_p7 = pnand %p1058_p5, %p1018_p13  ;;  %p1067_p2 = por %p1066_p0, %p1065_p12 }
  0x47   : > { %p1061_p9 = pneg %p1060_p7 }
  0x49   : > { %p1068_p1 = pnand %p1067_p2, %p1061_p9 }
  0x4b   : > { %1071 = shalt.err (!%p1068_p1)
}
  0x4c   : > { %933 = dma.hbm_to_vmem [thread:$0]  (!%p1331_p11), %s1605_s3, 512, %s1335_s8, [#allocation13], %s1230_s17, %s1230_s17, %s1231_s25  }
  0x4d   : > { %s37_s7 = sadd.s32 1, %s1222_s22  ;;  %s44_s9 = sadd.s32 1, %s1214_s20 }
  0x4e   : > { %p39_p13 = scmp.ge.s32.totalorder %s37_s7, 2  ;;  %p51_p6 = scmp.ne.s32.totalorder %s1214_s20, %s1210_s19 }
  0x4f   : > { %p52_p10 = scmp.eq.s32.totalorder %s1226_s23, 0  ;;  %p947_p3 = scmp.lt.s32.totalorder %s1226_s23, 2 }
  0x50   : > { %s1625_s7 = smov (%p39_p13, %s37_s7), 0  ;;  %p1607_p7 = scmp.eq.s32.totalorder %s1301_s24, 1 }
  0x51   : > { %1606 = sst [smem:[#allocation21_spill]] %s1625_s7  ;;  %p53_p5 = por %p52_p10, %p51_p6 }
  0x52   : > { %p1399_p9 = por %p1607_p7, %p51_p6  ;;  %s41_s10 = ssub.s32 %s1222_s22, %s1625_s7 }
  0x53   : > { %s227_s11 = sand.u32 1, %s1214_s20   ;;  %p42_p12 = scmp.eq.s32.totalorder %s41_s10, 0 }
  0x54   : > { %s1608_s6 = scalar_select %p1399_p9, 1, 0 }
  0x55   : > { %s1406_s8 = sshll.u32 %s227_s11, 3  ;;  %s836_s17 = sshll.u32 %s1222_s22, 7 }
  0x56   : > { %s1410_s25 = scalar_select %p42_p12, %s1214_s20, %s44_s9  }
  0x57   : > { %s1415_s14 = scalar_lea.hbm %s1585_s0, %s836_s17  ;;  %s231_s15 = scalar_lea.vmem [#allocation6], %s1406_s8 }
  0x58   : > { %s238_s30 = sshll.u32 %s231_s15, 4  ;;  %p1420_p11 = pnand %p947_p3, %p53_p5  ;;  %s1424_s30 = int_to_ptr.vmem [resolvable:$true] %s238_s30 }
  0x59   : > { %s1429_s10 = scalar_lea.hbm %s1586_s1, %s836_s17  ;;  %s228_s12 = scalar_lea.sflag [#allocation7], %s227_s11 }
  0x5a   : > { %s1072_s13 = scalar_lea.hbm %s1415_s14, 128  ;;  %p1074_p2 = pneg %p1420_p11 }
  0x5b   : > { %p1073_p0 = scmp.ne.s32.totalorder %s1415_s14, %s1072_s13  ;;  %s1077_s3 = scalar_lea.hbm %s1585_s0, 256 }
  0x5c   : > { %p1078_p6 = scmp.lt.u32.totalorder %s1415_s14, %s1585_s0  ;;  %p1079_p10 = scmp.lt.u32.totalorder %s1077_s3, %s1072_s13 }
  0x5d   : > { %p1075_p1 = pnand %p1074_p2, %p1073_p0  ;;  %p1081_p5 = scmp.lt.u32.totalorder %s1072_s13, %s1415_s14 }
  0x5e   : > { %p1080_p3 = por %p1079_p10, %p1078_p6 }
  0x5f   : > { %p1076_p13 = pneg %p1075_p1 }
  0x60   : > { %p1082_p7 = por %p1081_p5, %p1080_p3 }
  0x62   : > { %p1083_p12 = pnand %p1082_p7, %p1076_p13 }
  0x64   : > { %1086 = shalt.err (!%p1083_p12)
}
  0x65   : > { %s1087_s11 = scalar_lea.vmem %s1424_s30, 128  ;;  %s1232_s2 = smov [#allocation6]  }
  0x66   : > { %p1088_p0 = scmp.ne.s32.totalorder %s1424_s30, %s1087_s11  ;;  %s1092_s17 = sshll.u32 %s1232_s2, 4  ;;  %s1093_s17 = int_to_ptr.vmem [resolvable:$false] %s1092_s17 }
  0x67   : > { %s1094_s22 = scalar_lea.vmem %s1093_s17, 256  ;;  %p1095_p4 = scmp.lt.s32.totalorder %s1424_s30, %s1093_s17 }
  0x68   : > { %p1090_p1 = pnand %p1088_p0, %p1074_p2  ;;  %p1096_p6 = scmp.lt.s32.totalorder %s1094_s22, %s1087_s11 }
  0x6a   : > { %p1091_p9 = pneg %p1090_p1  ;;  %p1097_p10 = por %p1096_p6, %p1095_p4 }
  0x6c   : > { %p1098_p3 = pnand %p1097_p10, %p1091_p9 }
  0x6e   : > { %1101 = shalt.err (!%p1098_p3)
}
  0x6f   : > { %937 = dma.hbm_to_vmem [thread:$0]  (!%p1420_p11), %s1415_s14, 128, %s1424_s30, %s228_s12  }
  0x70   : > { %s245_s3 = sand.u32 1, %s1226_s23   ;;  %s249_s7 = scalar_lea.vmem [#allocation9], %s1406_s8 }
  0x71   : > { %s257_s29 = sshll.u32 %s249_s7, 4  ;;  %s246_s9 = scalar_lea.sflag [#allocation10], %s245_s3  ;;  %s258_s29 = int_to_ptr.vmem [resolvable:$true] %s257_s29 }
  0x72   : > { %s1102_s13 = scalar_lea.hbm %s1429_s10, 128  ;;  %s1107_s2 = scalar_lea.hbm %s1586_s1, 256 }
  0x73   : > { %p1103_p4 = scmp.ne.s32.totalorder %s1429_s10, %s1102_s13  ;;  %p1108_p5 = scmp.lt.u32.totalorder %s1429_s10, %s1586_s1 }
  0x74   : > { %p1109_p7 = scmp.lt.u32.totalorder %s1107_s2, %s1102_s13  ;;  %p1111_p0 = scmp.lt.u32.totalorder %s1102_s13, %s1429_s10 }
  0x75   : > { %p1105_p9 = pnand %p1103_p4, %p1074_p2 }
  0x76   : > { %p1110_p12 = por %p1109_p7, %p1108_p5 }
  0x77   : > { %p1106_p13 = pneg %p1105_p9 }
  0x78   : > { %p1112_p1 = por %p1111_p0, %p1110_p12 }
  0x7a   : > { %p1113_p6 = pnand %p1112_p1, %p1106_p13 }
  0x7c   : > { %1116 = shalt.err (!%p1113_p6)
}
  0x7d   : > { %s1117_s8 = scalar_lea.vmem %s258_s29, 128  ;;  %s1233_s14 = smov [#allocation9]  }
  0x7e   : > { %p1118_p10 = scmp.ne.s32.totalorder %s258_s29, %s1117_s8  ;;  %s1122_s30 = sshll.u32 %s1233_s14, 4  ;;  %s1123_s30 = int_to_ptr.vmem [resolvable:$false] %s1122_s30 }
  0x7f   : > { %s1124_s12 = scalar_lea.vmem %s1123_s30, 256  ;;  %p1125_p9 = scmp.lt.s32.totalorder %s258_s29, %s1123_s30 }
  0x80   : > { %p1120_p3 = pnand %p1118_p10, %p1074_p2  ;;  %p1126_p8 = scmp.lt.s32.totalorder %s1124_s12, %s1117_s8 }
  0x82   : > { %p1121_p4 = pneg %p1120_p3  ;;  %p1127_p5 = por %p1126_p8, %p1125_p9 }
  0x84   : > { %p1128_p7 = pnand %p1127_p5, %p1121_p4 }
  0x86   : > { %1131 = shalt.err (!%p1128_p7)
}
  0x87   : > { %940 = dma.hbm_to_vmem [thread:$0]  (!%p1420_p11), %s1429_s10, 128, %s258_s29, %s246_s9  }
  0x88   : > { %p1610_p13 = scmp.ne.s32.totalorder %s1602_s28, 0 }
  0x89   : > { %s1480_s3 = sand.u32 (!%p1610_p13), 1, %s1210_s19   ;;  %p1611_p8 = scmp.ne.s32.totalorder (!%p1610_p13), %s1600_s26, 0 }
  0x8a   : > { %266 = sbr.rel (%p1610_p13) target bundleno = 1411 (0x583), region = 40  ;;  %s1483_s7 = sshll.u32 (!%p1610_p13), %s1480_s3, 3 }
  0x8b   : > { %s269_s13 = scalar_lea.sflag (!%p1610_p13), [#allocation7], %s1480_s3  ;;  %s272_s15 = scalar_lea.vmem (!%p1610_p13), [#allocation6], %s1483_s7 }
  0x91   : > { %1185 = dma.done.wait (%p1611_p8), %s269_s13, 128  }
  0x92   : > { %1187 = vsyncadd (%p1611_p8), %s269_s13, 4294967168  ;;  %s277_s28 = sand.u32 1, %s1301_s24   ;;  %s281_s10 = scalar_lea.vmem [#allocation9], %s1483_s7 }
  0x93   : > { %s278_s16 = scalar_lea.sflag [#allocation10], %s277_s28 }
  0x94   : > { %1189 = dma.done.wait (%p1611_p8), %s278_s16, 128  }
  0x95   : > { %1191 = vsyncadd (%p1611_p8), %s278_s16, 4294967168  ;;  %p1612_p11 = scmp.eq.s32.totalorder %s1301_s24, 0 }
  0x97   : > { %1193 = dma.done.wait (%p1612_p11), [#allocation10], 512   ;;  %p1613_p2 = pmov %p1612_p11 }
  0x99   : > { %1195 = vsyncadd (%p1613_p2), [#allocation10], 4294966784  ;;  %p1614_p12 = pmov %p1613_p2 }
  0x9a   : > { %p1615_p0 = pmov %p1613_p2 }
  0x9b   : > { %1197 = dma.done.wait (%p1614_p12), [#allocation13], 512  }
  0x9c   : > { %1199 = vsyncadd (%p1615_p0), [#allocation13], 4294966784  ;;  %vm330_vm0 = vcmask 261120   ;;  %v1234_v0 = vmov 0.0|0.0   ;;  %vm1235_vm1 = vmmov 0   ;;  %v1236_v1 = vmov 0.0  }
  0x9d   : > { %901 = vmatprep.subr.bf16.mxu0 %v1234_v0  ;;  %877 = vmatprep.mubr.msk.f32.mxu0 %vm1235_vm1, %v1236_v1  ;;  %409 = vst.msk [vmem:[#allocation5] sm:$0xff] %vm330_vm0, %v1236_v1  ;;  %v326_v2 = vld [vmem:[#allocation11] sm:$0xff]  ;;  %v327_v3 = vld [vmem:[#allocation11 + $0x8] sm:$0xff]  ;;  %v328_v4 = vld [vmem:[#allocation11 + $0x10] sm:$0xff]  ;;  %vm406_vm2 = vcmask 7168   ;;  %v1237_v14 = vmov -inf  }
  0x9e   : > { %880 = vmatprep.subr.mxu1 %v1236_v1  ;;  %882 = vmatprep.mubr.msk.f32.mxu1 %vm1235_vm1, %v1236_v1  ;;  %v902_v5 = vpack.c.bf16 %v327_v3, %v326_v2  ;;  %v329_v6 = vld [vmem:[#allocation11 + $0x18] sm:$0xff]  ;;  %v325_v8 = vld [vmem:[%s272_s15] sm:$0xff]  ;;  %407 = vst.msk [vmem:[#allocation3] sm:$0xff] %vm406_vm2, %v1237_v14  ;;  %408 = vst.msk [vmem:[#allocation4] sm:$0xff] %vm406_vm2, %v1236_v1  ;;  %vm490_vm3 = vcmask 64512   ;;  %v1238_v18 = vmov 0  }
  0x9f   : > { %v905_v7 = vpack.c.bf16 %v329_v6, %v328_v4  ;;  %v410_v9 = vld [vmem:[%s281_s10] sm:$0xff]  ;;  %1008 = vset.pattern.permute.xlu0 %v1238_v18  ;;  %1009 = vset.pattern.permute.xlu1 %v1238_v18  ;;  %v609_v30 = vld [vmem:[#allocation12] sm:$0xff]  ;;  %v610_v31 = vld [vmem:[#allocation12 + $0x8] sm:$0xff]  ;;  %s852_s29 = sshll.u32 %s1218_s21, 7  ;;  %s320_s9 = scalar_lea.vmem [#allocation14], %s1483_s7 }
  0xa0   : > { %903 = vmatpush3.bf16.msra.mxu0 %v902_v5  ;;  %881 = vmatpush3.xpose.msk.msra.mxu1 %vm330_vm0, %v410_v9  ;;  %v611_v32 = vld [vmem:[#allocation12 + $0x10] sm:$0xff]  ;;  %v908_v33 = vpack.c.bf16 %v610_v31, %v609_v30  ;;  %v612_v34 = vld [vmem:[#allocation12 + $0x18] sm:$0xff]  ;;  %v849_v51 = vld [vmem:[%s1589_s4] ss:$0 sm:$0xff]  ;;  %s708_s11 = sshll.u32 %s320_s9, 4  ;;  %s1535_s22 = scalar_lea.hbm %s1590_s5, %s852_s29  ;;  %s1537_s11 = int_to_ptr.vmem [resolvable:$true] %s708_s11 }
  0xa1   : > { %904 = vmatprep.subr.bf16.mxu0 %v1234_v0  ;;  %885 = vmatprep.subr.mxu1 %v1236_v1  ;;  %v911_v35 = vpack.c.bf16 %v612_v34, %v611_v32  ;;  %s695_s8 = scalar_lea.sflag [#allocation8], %s1480_s3  ;;  %s1132_s14 = scalar_lea.vmem %s1537_s11, 128 }
  0xa2   : > { %p1133_p1 = scmp.ne.s32.totalorder %s1537_s11, %s1132_s14  ;;  %p1616_p6 = scmp.ne.s32.totalorder %s1608_s6, 0 }
  0xa3   : > { %s1239_s21 = smov [#allocation14]  }
  0xa4   : > { %906 = vmatpush3.bf16.msra.mxu0 %v905_v7  ;;  %v514_v42 = vld [vmem:[#allocation5] sm:$0xff]  ;;  %p1134_p10 = pnand %p1133_p1, %p1616_p6  ;;  %s1136_s30 = sshll.u32 %s1239_s21, 4  ;;  %s1137_s30 = int_to_ptr.vmem [resolvable:$false] %s1136_s30 }
  0xa5   : > { %907 = vmatprep.subr.bf16.mxu0 %v1234_v0  ;;  %v489_v19 = vld [vmem:[#allocation3] sm:$0xff]  ;;  %v506_v36 = vld [vmem:[#allocation4] sm:$0xff]  ;;  %s1138_s12 = scalar_lea.vmem %s1137_s30, 256  ;;  %p1139_p4 = scmp.lt.s32.totalorder %s1537_s11, %s1137_s30 }
  0xa6   : > { %p1135_p3 = pneg %p1134_p10  ;;  %p1140_p9 = scmp.lt.s32.totalorder %s1138_s12, %s1132_s14 }
  0xa7   : > { %878 = vmatmul.mubr.msk.f32.vlgmr.msra.gmra.mrb[0].mxu0 %vm330_vm0, %v325_v8 }
  0xa8   : > { %898 = vmatprep.mubr.msk.f32.mxu0 %vm1235_vm1, %v1236_v1  ;;  %909 = vmatpush3.bf16.msra.mxu0 %v908_v33  ;;  %p1141_p5 = por %p1140_p9, %p1139_p4 }
  0xa9   : > { %910 = vmatprep.subr.bf16.mxu0 %v1234_v0 }
  0xaa   : > { %p1142_p7 = pnand %p1141_p5, %p1135_p3 }
  0xac   : > { %912 = vmatpush3.bf16.msra.mxu0 %v911_v35 }
 0x17a   : > { %v400_v10 = vpop.f32.mrb[0].mxu0 }
 0x17b   : > { %v404_v11 = vmul.f32 0.5, %v400_v10  ;;  %v879_v12 = vpop.f32.mrb[1].mxu0 }
 0x17d   : > { %405 = vst.msk [vmem:[#allocation2] sm:$0xff] %vm330_vm0, %v404_v11 }
 0x184   : > { %v411_v13 = vld [vmem:[#allocation2] sm:$0xff] }
 0x185   : > { %883 = vmatmul.mubr.msk.f32.vlgmr.msra.gmra.mrb[0].mxu1 %vm330_vm0, %v411_v13 }
 0x186   : > { %886 = vmatpush3.msra.mxu1 %v410_v9  ;;  %887 = vmatprep.mubr.msk.f32.mxu1 %vm1235_vm1, %v1236_v1 }
 0x258   : > { %v485_v15 = vpop.f32.mrb[0].mxu1 }
 0x259   : > { %v884_v16 = vpop.f32.mrb[1].mxu1  ;;  %v491_v17 = vsel %vm490_vm3, %v485_v15, -inf }
 0x25a   : > { %492 = vmax.xlane.f32.xlu0 %v491_v17 }
 0x2e7   : > { %v493_v20 = vpop.xlane.xlu0 %492 }
 0x2e8   : > { %v494_v21 = vmax.f32 %v489_v19, %v493_v20 }
 0x2ea   : > { %v495_v22 = vsub.f32 %v489_v19, %v494_v21  ;;  %596 = vst.msk [vmem:[#allocation3] sm:$0xff] %vm406_vm2, %v494_v21  ;;  %500 = vperm.xlu0 %1008, %v494_v21  }
 0x2ec   : > { %v496_v28 = vmul.f32 1.442695, %v495_v22 }
 0x369   : > { %v501_v23 = vpop.permute.xlu0 %500 }
 0x36a   : > { %v503_v24 = vsub.f32 %v485_v15, %v501_v23 }
 0x36c   : > { %v504_v25 = vmul.f32 1.442695, %v503_v24 }
 0x36e   : > { %1010 = vpow2.f32 %v504_v25 }
 0x36f   : > { %1012 = vpow2.f32 %v496_v28 }
 0x378   : > { %v1011_v26 = vpop.eup %1010 }
 0x379   : > { %888 = vmatmul.mubr.msk.f32.vlgmr.msra.gmra.mrb[2].mxu1 %vm490_vm3, %v1011_v26  ;;  %v508_v27 = vsel %vm490_vm3, %v1011_v26, 0.0  ;;  %v1013_v29 = vpop.eup %1012 }
 0x37a   : > { %509 = vadd.xlane.f32.xlu1 %v508_v27  ;;  %v507_v37 = vmul.f32 %v1013_v29, %v506_v36 }
 0x38b   : > { %517 = vperm.xlu1 %1009, %v1013_v29  }
 0x407   : > { %v510_v38 = vpop.xlane.xlu1 %509 }
 0x408   : > { %v511_v39 = vadd.f32 %v510_v38, %v507_v37 }
 0x40a   : > { %513 = vst.msk [vmem:[#allocation4] sm:$0xff] %vm406_vm2, %v511_v39 }
 0x40b   : > { %v518_v43 = vpop.permute.xlu1 %517 }
 0x40c   : > { %v520_v44 = vmul.f32 %v518_v43, %v514_v42 }
 0x411   : > { %v600_v40 = vld [vmem:[#allocation4] sm:$0xff] }
 0x412   : > { %1014 = vrcp.f32 %v600_v40 }
 0x41c   : > { %v1015_v41 = vpop.eup %1014 }
 0x41d   : > { %605 = vperm.xlu1 %1009, %v1015_v41  }
 0x44c   : > { %v590_v45 = vpop.f32.mrb[2].mxu1 }
 0x44d   : > { %v594_v46 = vadd.f32 %v590_v45, %v520_v44  ;;  %v889_v47 = vpop.f32.mrb[3].mxu1 }
 0x44f   : > { %595 = vst.msk [vmem:[#allocation5] sm:$0xff] %vm330_vm0, %v594_v46 }
 0x456   : > { %v602_v49 = vld [vmem:[#allocation5] sm:$0xff] }
 0x49c   : > { %v606_v48 = vpop.permute.xlu1 %605 }
 0x49d   : > { %v608_v50 = vmul.f32 %v606_v48, %v602_v49 }
 0x49f   : > { %899 = vmatmul.mubr.msk.f32.vlgmr.msra.gmra.mrb[2].mxu0 %vm330_vm0, %v608_v50 }
 0x572   : > { %v689_v52 = vpop.f32.mrb[2].mxu0 }
 0x573   : > { %v690_v53 = vadd.f32 %v849_v51, %v689_v52  ;;  %v900_v54 = vpop.f32.mrb[3].mxu0 }
 0x575   : > { %693 = vst.msk [vmem:[%s320_s9] sm:$0xff] %vm330_vm0, %v690_v53 }
 0x576   : > { %1145 = shalt.err (!%p1142_p7)
}
 0x577   : > { %s1146_s3 = scalar_lea.hbm %s1535_s22, 128  ;;  %s1150_s15 = scalar_lea.hbm %s1590_s5, 256 }
 0x578   : > { %p1147_p13 = scmp.ne.s32.totalorder %s1535_s22, %s1146_s3  ;;  %p1151_p2 = scmp.lt.u32.totalorder %s1535_s22, %s1590_s5 }
 0x579   : > { %p1152_p12 = scmp.lt.u32.totalorder %s1150_s15, %s1146_s3  ;;  %p1154_p1 = scmp.lt.u32.totalorder %s1146_s3, %s1535_s22 }
 0x57a   : > { %p1148_p8 = pnand %p1147_p13, %p1616_p6 }
 0x57b   : > { %p1153_p0 = por %p1152_p12, %p1151_p2 }
 0x57c   : > { %p1149_p11 = pneg %p1148_p8 }
 0x57d   : > { %p1155_p10 = por %p1154_p1, %p1153_p0 }
 0x57f   : > { %p1156_p3 = pnand %p1155_p10, %p1149_p11 }
 0x581   : > { %1159 = shalt.err (!%p1156_p3)
}
 0x582   : > { %925 = dma.vmem_to_hbm [thread:$0]  (%p1616_p6), %s1537_s11, 128, %s1535_s22, %s695_s8  }
 0x583 PF: > { %s720_s10 = sand.u32 1, %s1206_s18   ;;  %p1617_p4 = scmp.ne.s32.totalorder %s1601_s27, 0 }
 0x584   : > { %p1618_p9 = scmp.ge.s32.totalorder %s1226_s23, 2  ;;  %s721_s24 = scalar_lea.sflag [#allocation8], %s720_s10 }
 0x586   : > { %p942_p5 = pnand %p1618_p9, %p1617_p4 }
 0x588   : > { %1201 = dma.done.wait (!%p942_p5), %s721_s24, 128  }
 0x589   : > { %1203 = vsyncadd (!%p942_p5), %s721_s24, 4294967168  ;;  %s25_s23 = sadd.s32 1, %s1226_s23   ;;  %s1619_s21 = sld [smem:[#allocation20_spill]] }
 0x58a   : > { %p22_p7 = scmp.ge.s32.totalorder %s25_s23, 4   ;;  %s1620_s22 = sld [smem:[#allocation21_spill]] }
 0x58b   : > { %s1621_s18 = smov %s1210_s19  ;;  %s1622_s19 = smov %s1214_s20 }
 0x58c   : > { %s1623_s20 = smov %s1410_s25  ;;  %24 = sbr.rel (!%p22_p7) target bundleno = 12 (0xc), region = 114 }
 0x593   :  { %726 = vsyncpa [#allocation7], 1 }
 0x594   :  { %728 = vsyncpa [#allocation7 + $0x1], 1 }
 0x595   :  { %729 = vsyncpa [#allocation10], 1 }
 0x596   :  { %731 = vsyncpa [#allocation10 + $0x1], 1 }
 0x597   :  { %732 = vsyncpa [#allocation13], 1 }
 0x598   :  { %733 = vsyncpa [#allocation8], 1 }
 0x599   :  { %735 = vsyncpa [#allocation8 + $0x1], 1 }

</bundles_post_ra>
